<compile_context>
chip_gen: v5e
topology: v5e:2x2
jax: 0.10.0
libtpu: 0.0.40
codegen_flags: <defaults>
</compile_context>

<pallas_src>
import jax
import jax.numpy as jnp
from jax.experimental import pallas as pl
from jax.experimental.pallas import tpu as pltpu

VMEM_LIMIT_BYTES = 48 * 1024 * 1024  # safe on v5e/v6e (128 MiB) and v7x (64 MiB)


def _pick_tile(out_features, desired=512):
    """Largest lane-dense tile dividing OUT, preferring a grid length >= 2
    (v7x has 2 TensorCores; the parallel grid axis is how they both get work)."""
    candidates = [t for t in (desired, 384, 256, 128) if out_features % t == 0]
    for t in candidates:
        if out_features // t >= 2:
            return t
    if candidates:
        return candidates[0]
    return out_features  # fallback: full width (block == array dim is legal)


def _full_spec(shape):
    return pl.BlockSpec(shape, lambda j: (0,) * len(shape))


# ----------------------------------------------------------------------------
# Kernel 1 (prologue): x_masked = x + tkw @ mask_W ; LoRA gating for gate & up
#   xi_g = (x_masked @ qa_g) * (tkw @ mup_g)    (B, R)
#   xi_u = (x_masked @ qa_u) * (tkw @ mup_u)    (B, R)
# Everything here is tiny (rank-8 / n_fused-4); one launch, outputs in bf16.
# ----------------------------------------------------------------------------
def _prologue_kernel(x_ref, tkw_ref, maskw_ref, qag_ref, mupg_ref, qau_ref,
                     mupu_ref, xm_ref, xig_ref, xiu_ref):
    tkw_bf = tkw_ref[...].astype(jnp.bfloat16)
    xm = x_ref[...] + jnp.dot(tkw_bf, maskw_ref[...],
                              preferred_element_type=jnp.float32)
    xm_bf = xm.astype(jnp.bfloat16)
    xm_ref[...] = xm_bf
    gate_g = jnp.dot(tkw_bf, mupg_ref[...], preferred_element_type=jnp.float32)
    gate_u = jnp.dot(tkw_bf, mupu_ref[...], preferred_element_type=jnp.float32)
    xig = jnp.dot(xm_bf, qag_ref[...], preferred_element_type=jnp.float32) * gate_g
    xiu = jnp.dot(xm_bf, qau_ref[...], preferred_element_type=jnp.float32) * gate_u
    xig_ref[...] = xig.astype(jnp.bfloat16)
    xiu_ref[...] = xiu.astype(jnp.bfloat16)


def mask_and_lora_prologue(x, tkw, mask_w_t, qa_g, mup_g, qa_u, mup_u):
    B, H = x.shape
    K = tkw.shape[1]
    R = qa_g.shape[1]
    return pl.pallas_call(
        _prologue_kernel,
        out_shape=(
            jax.ShapeDtypeStruct((B, H), jnp.bfloat16),   # x_masked (matmul LHS)
            jax.ShapeDtypeStruct((B, R), jnp.bfloat16),   # xi_gate
            jax.ShapeDtypeStruct((B, R), jnp.bfloat16),   # xi_up
        ),
        grid=(1,),
        in_specs=[
            _full_spec((B, H)), _full_spec((B, K)), _full_spec((K, H)),
            _full_spec((H, R)), _full_spec((K, R)),
            _full_spec((H, R)), _full_spec((K, R)),
        ],
        out_specs=(_full_spec((B, H)), _full_spec((B, R)), _full_spec((B, R))),
    )(x, tkw, mask_w_t, qa_g, mup_g, qa_u, mup_u)


# ----------------------------------------------------------------------------
# Kernel 2: fused gate_proj + up_proj + silu(gate)*up, tiled over the
# intermediate (output-feature) axis.  Per tile:
#   out0  = x_masked @ W_tile                (MXU, bf16 in / f32 acc)
#   ad    = xi @ qb_tile
#   scale = mean(|out0|,0) / (mean(|ad|,0)+1e-8)   (full batch in-tile -> exact)
#   g/u   = out0 + scale * ad ;  h = silu(g) * u
# Small (B,*) inputs use a constant index_map -> fetched once, resident.
# ----------------------------------------------------------------------------
def _lora_cols(x, xi, w_ref, qb_ref):
    out0 = jnp.dot(x, w_ref[...], preferred_element_type=jnp.float32)
    ad = jnp.dot(xi, qb_ref[...], preferred_element_type=jnp.float32)
    scale = jnp.mean(jnp.abs(out0), axis=0, keepdims=True) / (
        jnp.mean(jnp.abs(ad), axis=0, keepdims=True) + 1e-8)
    return out0 + scale * ad


def _gate_up_silu_kernel(xm_ref, xig_ref, xiu_ref,
                         wg_ref, qbg_ref, wu_ref, qbu_ref, h_ref):
    xm = xm_ref[...]
    g = _lora_cols(xm, xig_ref[...], wg_ref, qbg_ref)
    u = _lora_cols(xm, xiu_ref[...], wu_ref, qbu_ref)
    h_ref[...] = ((g * jax.nn.sigmoid(g)) * u).astype(h_ref.dtype)


def gate_up_silu(xm, xi_g, xi_u, wg_t, qbg_t, wu_t, qbu_t, *, tile=None):
    B, H = xm.shape
    R = xi_g.shape[1]
    I = wg_t.shape[1]
    tile = _pick_tile(I) if tile is None else tile
    assert I % tile == 0
    # TODO(synk): for very large I, bump streamed-weight specs to
    # pipeline_mode=pl.Buffered(3) if DMA becomes exposed (watch v7x VMEM).
    return pl.pallas_call(
        _gate_up_silu_kernel,
        out_shape=jax.ShapeDtypeStruct((B, I), jnp.bfloat16),
        grid=(I // tile,),
        in_specs=[
            pl.BlockSpec((B, H), lambda j: (0, 0)),
            pl.BlockSpec((B, R), lambda j: (0, 0)),
            pl.BlockSpec((B, R), lambda j: (0, 0)),
            pl.BlockSpec((H, tile), lambda j: (0, j)),
            pl.BlockSpec((R, tile), lambda j: (0, j)),
            pl.BlockSpec((H, tile), lambda j: (0, j)),
            pl.BlockSpec((R, tile), lambda j: (0, j)),
        ],
        out_specs=pl.BlockSpec((B, tile), lambda j: (0, j)),
        compiler_params=pltpu.CompilerParams(
            dimension_semantics=("parallel",),
            vmem_limit_bytes=VMEM_LIMIT_BYTES,
        ),
    )(xm, xi_g, xi_u, wg_t, qbg_t, wu_t, qbu_t)


# ----------------------------------------------------------------------------
# Kernel 3 (prologue for down_proj): xi_d = (h @ qa_d) * (tkw @ mup_d)
# ----------------------------------------------------------------------------
def _down_prologue_kernel(h_ref, tkw_ref, qad_ref, mupd_ref, xid_ref):
    gate = jnp.dot(tkw_ref[...].astype(jnp.bfloat16), mupd_ref[...],
                   preferred_element_type=jnp.float32)
    xi = jnp.dot(h_ref[...], qad_ref[...], preferred_element_type=jnp.float32) * gate
    xid_ref[...] = xi.astype(jnp.bfloat16)


def down_prologue(h, tkw, qa_d, mup_d):
    B, I = h.shape
    K = tkw.shape[1]
    R = qa_d.shape[1]
    return pl.pallas_call(
        _down_prologue_kernel,
        out_shape=jax.ShapeDtypeStruct((B, R), jnp.bfloat16),
        grid=(1,),
        in_specs=[_full_spec((B, I)), _full_spec((B, K)),
                  _full_spec((I, R)), _full_spec((K, R))],
        out_specs=_full_spec((B, R)),
    )(h, tkw, qa_d, mup_d)


# ----------------------------------------------------------------------------
# Kernel 4: down_proj FusedLinear (lora), tiled over the hidden axis.
# ----------------------------------------------------------------------------
def _lora_linear_kernel(x_ref, xi_ref, w_ref, qb_ref, o_ref):
    o_ref[...] = _lora_cols(x_ref[...], xi_ref[...], w_ref, qb_ref).astype(o_ref.dtype)


def lora_linear(x, xi, w_t, qb_t, *, out_dtype=jnp.float32, tile=None):
    B, IN = x.shape
    R = xi.shape[1]
    OUT = w_t.shape[1]
    tile = _pick_tile(OUT) if tile is None else tile
    assert OUT % tile == 0
    return pl.pallas_call(
        _lora_linear_kernel,
        out_shape=jax.ShapeDtypeStruct((B, OUT), out_dtype),
        grid=(OUT // tile,),
        in_specs=[
            pl.BlockSpec((B, IN), lambda j: (0, 0)),
            pl.BlockSpec((B, R), lambda j: (0, 0)),
            pl.BlockSpec((IN, tile), lambda j: (0, j)),
            pl.BlockSpec((R, tile), lambda j: (0, j)),
        ],
        out_specs=pl.BlockSpec((B, tile), lambda j: (0, j)),
        compiler_params=pltpu.CompilerParams(
            dimension_semantics=("parallel",),
            vmem_limit_bytes=VMEM_LIMIT_BYTES,
        ),
    )(x, xi, w_t, qb_t)


# ----------------------------------------------------------------------------
# FusedMLP wrapper (weights stored in bf16, pre-transposed to (in, out))
# ----------------------------------------------------------------------------
def init_params(key, hidden, inter, n_fused, rank, dtype=jnp.bfloat16):
    ks = jax.random.split(key, 13)

    def linear_w_t(k, fan_in, fan_out):
        bound = 1.0 / jnp.sqrt(fan_in)
        w = jax.random.uniform(k, (fan_in, fan_out), jnp.float32, -bound, bound)
        return w.astype(dtype)

    def lora_block(k0, k1, k2, k3, fan_in, fan_out):
        return dict(
            w_t=linear_w_t(k0, fan_in, fan_out),
            qa_t=(0.02 * jax.random.normal(k1, (fan_in, rank), jnp.float32)).astype(dtype),
            qb_t=(0.02 * jax.random.normal(k2, (rank, fan_out), jnp.float32)).astype(dtype),
            mup=(0.02 * jax.random.normal(k3, (n_fused, rank), jnp.float32)).astype(dtype),
        )

    return dict(
        mask_w_t=(0.02 * jax.random.normal(ks[0], (n_fused, hidden), jnp.float32)).astype(dtype),
        gate=lora_block(ks[1], ks[2], ks[3], ks[4], hidden, inter),
        up=lora_block(ks[5], ks[6], ks[7], ks[8], hidden, inter),
        down=lora_block(ks[9], ks[10], ks[11], ks[12], inter, hidden),
    )


def fused_mlp_forward(params, x, top_k_weights):
    g, u, d = params["gate"], params["up"], params["down"]
    xm, xi_g, xi_u = mask_and_lora_prologue(
        x, top_k_weights, params["mask_w_t"],
        g["qa_t"], g["mup"], u["qa_t"], u["mup"])
    h = gate_up_silu(xm, xi_g, xi_u, g["w_t"], g["qb_t"], u["w_t"], u["qb_t"])
    xi_d = down_prologue(h, top_k_weights, d["qa_t"], d["mup"])
    return lora_linear(h, xi_d, d["w_t"], d["qb_t"], out_dtype=x.dtype)


# ----------------------------------------------------------------------------
# Pure-JAX reference with the same bf16-in / f32-accumulate numerics
# ----------------------------------------------------------------------------
def _ref_lora(x_bf, xi_bf, w_t, qb_t):
    out0 = jnp.dot(x_bf, w_t, preferred_element_type=jnp.float32)
    ad = jnp.dot(xi_bf, qb_t, preferred_element_type=jnp.float32)
    scale = jnp.mean(jnp.abs(out0), axis=0) / (jnp.mean(jnp.abs(ad), axis=0) + 1e-8)
    return out0 + scale[None, :] * ad


def ref_forward(params, x, tkw):
    bf = jnp.bfloat16
    tkw_bf = tkw.astype(bf)
    xm = x + jnp.dot(tkw_bf, params["mask_w_t"], preferred_element_type=jnp.float32)
    xm_bf = xm.astype(bf)

    def xi(p, act_bf):
        gate = jnp.dot(tkw_bf, p["mup"], preferred_element_type=jnp.float32)
        v = jnp.dot(act_bf, p["qa_t"], preferred_element_type=jnp.float32) * gate
        return v.astype(bf)

    g = _ref_lora(xm_bf, xi(params["gate"], xm_bf),
                  params["gate"]["w_t"], params["gate"]["qb_t"])
    u = _ref_lora(xm_bf, xi(params["up"], xm_bf),
                  params["up"]["w_t"], params["up"]["qb_t"])
    h_bf = (jax.nn.silu(g) * u).astype(bf)
    return _ref_lora(h_bf, xi(params["down"], h_bf),
                     params["down"]["w_t"], params["down"]["qb_t"])


if __name__ == "__main__":
    # batch, hidden, intermediate, n_fused, rank
    B, H, I, K, R = 8, 256, 512, 4, 8

    key = jax.random.PRNGKey(0)
    kx, kw, kp = jax.random.split(key, 3)
    x = jax.random.normal(kx, (B, H), jnp.float32)
    logits = jax.random.normal(kw, (B, K), jnp.float32)
    top_k_weights = jax.nn.softmax(logits, axis=-1)

    params = init_params(kp, H, I, K, R)

    out = jax.block_until_ready(fused_mlp_forward(params, x, top_k_weights))
    ref = jax.block_until_ready(ref_forward(params, x, top_k_weights))

    assert out.shape == (B, H)
    assert out.dtype == jnp.float32
    assert jnp.allclose(out, ref, rtol=2e-3, atol=2e-3), "mismatch vs reference"
    print("KERNEL_OK")
</pallas_src>

<mosaic_0001>
module attributes {stable_mosaic.version = 11 : i64} {
  func.func @_prologue_kernel(%arg0: i32, %arg1: memref<8x256xf32, #tpu.memory_space<vmem>>, %arg2: memref<8x4xf32, #tpu.memory_space<vmem>>, %arg3: memref<4x256xbf16, #tpu.memory_space<vmem>>, %arg4: memref<256x8xbf16, #tpu.memory_space<vmem>>, %arg5: memref<4x8xbf16, #tpu.memory_space<vmem>>, %arg6: memref<256x8xbf16, #tpu.memory_space<vmem>>, %arg7: memref<4x8xbf16, #tpu.memory_space<vmem>>, %arg8: memref<8x256xbf16, #tpu.memory_space<vmem>>, %arg9: memref<8x8xbf16, #tpu.memory_space<vmem>>, %arg10: memref<8x8xbf16, #tpu.memory_space<vmem>>) attributes {dimension_semantics = [#tpu.dimension_semantics<arbitrary>], iteration_bounds = array<i64: 1>, scalar_prefetch = 0 : i64, scratch_operands = 0 : i64, tpu.core_type = #tpu.core_type<tc>, window_params = [{pipeline_mode = #tpu.pipeline_mode<synchronous>, transform_indices = @transform_0, window_bounds = array<i64: 8, 256>}, {pipeline_mode = #tpu.pipeline_mode<synchronous>, transform_indices = @transform_1, window_bounds = array<i64: 8, 4>}, {pipeline_mode = #tpu.pipeline_mode<synchronous>, transform_indices = @transform_2, window_bounds = array<i64: 4, 256>}, {pipeline_mode = #tpu.pipeline_mode<synchronous>, transform_indices = @transform_3, window_bounds = array<i64: 256, 8>}, {pipeline_mode = #tpu.pipeline_mode<synchronous>, transform_indices = @transform_4, window_bounds = array<i64: 4, 8>}, {pipeline_mode = #tpu.pipeline_mode<synchronous>, transform_indices = @transform_5, window_bounds = array<i64: 256, 8>}, {pipeline_mode = #tpu.pipeline_mode<synchronous>, transform_indices = @transform_6, window_bounds = array<i64: 4, 8>}, {pipeline_mode = #tpu.pipeline_mode<synchronous>, transform_indices = @transform_7, window_bounds = array<i64: 8, 256>}, {pipeline_mode = #tpu.pipeline_mode<synchronous>, transform_indices = @transform_8, window_bounds = array<i64: 8, 8>}, {pipeline_mode = #tpu.pipeline_mode<synchronous>, transform_indices = @transform_9, window_bounds = array<i64: 8, 8>}]} {
    %c0 = arith.constant 0 : index
    %c0_0 = arith.constant 0 : index
    %0 = vector.load %arg2[%c0, %c0_0] : memref<8x4xf32, #tpu.memory_space<vmem>>, vector<8x4xf32>
    %1 = arith.truncf %0 : vector<8x4xf32> to vector<8x4xbf16>
    %c0_1 = arith.constant 0 : index
    %c0_2 = arith.constant 0 : index
    %2 = vector.load %arg1[%c0_1, %c0_2] : memref<8x256xf32, #tpu.memory_space<vmem>>, vector<8x256xf32>
    %c0_3 = arith.constant 0 : index
    %c0_4 = arith.constant 0 : index
    %3 = vector.load %arg3[%c0_3, %c0_4] : memref<4x256xbf16, #tpu.memory_space<vmem>>, vector<4x256xbf16>
    %cst = arith.constant dense<0.000000e+00> : vector<8x256xf32>
    %4 = tpu.matmul %1, %3, %cst {dimension_numbers = #tpu.dot_dimension_numbers<[1], [0], [0], [1], [0, 0, 1, 1], [], []>} : vector<8x4xbf16>, vector<4x256xbf16>, vector<8x256xf32> -> vector<8x256xf32>
    %5 = arith.addf %2, %4 : vector<8x256xf32>
    %6 = arith.truncf %5 : vector<8x256xf32> to vector<8x256xbf16>
    %c0_5 = arith.constant 0 : index
    %c0_6 = arith.constant 0 : index
    %7 = vector.load %arg8[%c0_5, %c0_6] : memref<8x256xbf16, #tpu.memory_space<vmem>>, vector<8x256xbf16>
    tpu.vector_store %arg8[%c0_5, %c0_6], %6 {strides = array<i32>} : memref<8x256xbf16, #tpu.memory_space<vmem>>, vector<8x256xbf16>,
    %c0_7 = arith.constant 0 : index
    %c0_8 = arith.constant 0 : index
    %8 = vector.load %arg5[%c0_7, %c0_8] : memref<4x8xbf16, #tpu.memory_space<vmem>>, vector<4x8xbf16>
    %cst_9 = arith.constant dense<0.000000e+00> : vector<8x8xf32>
    %9 = tpu.matmul %1, %8, %cst_9 {dimension_numbers = #tpu.dot_dimension_numbers<[1], [0], [0], [1], [0, 0, 1, 1], [], []>} : vector<8x4xbf16>, vector<4x8xbf16>, vector<8x8xf32> -> vector<8x8xf32>
    %c0_10 = arith.constant 0 : index
    %c0_11 = arith.constant 0 : index
    %10 = vector.load %arg7[%c0_10, %c0_11] : memref<4x8xbf16, #tpu.memory_space<vmem>>, vector<4x8xbf16>
    %cst_12 = arith.constant dense<0.000000e+00> : vector<8x8xf32>
    %11 = tpu.matmul %1, %10, %cst_12 {dimension_numbers = #tpu.dot_dimension_numbers<[1], [0], [0], [1], [0, 0, 1, 1], [], []>} : vector<8x4xbf16>, vector<4x8xbf16>, vector<8x8xf32> -> vector<8x8xf32>
    %c0_13 = arith.constant 0 : index
    %c0_14 = arith.constant 0 : index
    %12 = vector.load %arg4[%c0_13, %c0_14] : memref<256x8xbf16, #tpu.memory_space<vmem>>, vector<256x8xbf16>
    %cst_15 = arith.constant dense<0.000000e+00> : vector<8x8xf32>
    %13 = tpu.matmul %6, %12, %cst_15 {dimension_numbers = #tpu.dot_dimension_numbers<[1], [0], [0], [1], [0, 0, 1, 1], [], []>} : vector<8x256xbf16>, vector<256x8xbf16>, vector<8x8xf32> -> vector<8x8xf32>
    %14 = arith.mulf %13, %9 : vector<8x8xf32>
    %c0_16 = arith.constant 0 : index
    %c0_17 = arith.constant 0 : index
    %15 = vector.load %arg6[%c0_16, %c0_17] : memref<256x8xbf16, #tpu.memory_space<vmem>>, vector<256x8xbf16>
    %cst_18 = arith.constant dense<0.000000e+00> : vector<8x8xf32>
    %16 = tpu.matmul %6, %15, %cst_18 {dimension_numbers = #tpu.dot_dimension_numbers<[1], [0], [0], [1], [0, 0, 1, 1], [], []>} : vector<8x256xbf16>, vector<256x8xbf16>, vector<8x8xf32> -> vector<8x8xf32>
    %17 = arith.mulf %16, %11 : vector<8x8xf32>
    %18 = arith.truncf %14 : vector<8x8xf32> to vector<8x8xbf16>
    %c0_19 = arith.constant 0 : index
    %c0_20 = arith.constant 0 : index
    %19 = vector.load %arg9[%c0_19, %c0_20] : memref<8x8xbf16, #tpu.memory_space<vmem>>, vector<8x8xbf16>
    tpu.vector_store %arg9[%c0_19, %c0_20], %18 {strides = array<i32>} : memref<8x8xbf16, #tpu.memory_space<vmem>>, vector<8x8xbf16>,
    %20 = arith.truncf %17 : vector<8x8xf32> to vector<8x8xbf16>
    %c0_21 = arith.constant 0 : index
    %c0_22 = arith.constant 0 : index
    %21 = vector.load %arg10[%c0_21, %c0_22] : memref<8x8xbf16, #tpu.memory_space<vmem>>, vector<8x8xbf16>
    tpu.vector_store %arg10[%c0_21, %c0_22], %20 {strides = array<i32>} : memref<8x8xbf16, #tpu.memory_space<vmem>>, vector<8x8xbf16>,
    return
  }
  func.func @transform_0(%arg0: i32) -> (i32, i32) {
    %c0_i32 = arith.constant 0 : i32
    %c0_i32_0 = arith.constant 0 : i32
    %c0_i32_1 = arith.constant 0 : i32
    return %c0_i32, %c0_i32_0 : i32, i32
  }
  func.func @transform_1(%arg0: i32) -> (i32, i32) {
    %c0_i32 = arith.constant 0 : i32
    %c0_i32_0 = arith.constant 0 : i32
    %c0_i32_1 = arith.constant 0 : i32
    return %c0_i32, %c0_i32_0 : i32, i32
  }
  func.func @transform_2(%arg0: i32) -> (i32, i32) {
    %c0_i32 = arith.constant 0 : i32
    %c0_i32_0 = arith.constant 0 : i32
    %c0_i32_1 = arith.constant 0 : i32
    return %c0_i32, %c0_i32_0 : i32, i32
  }
  func.func @transform_3(%arg0: i32) -> (i32, i32) {
    %c0_i32 = arith.constant 0 : i32
    %c0_i32_0 = arith.constant 0 : i32
    %c0_i32_1 = arith.constant 0 : i32
    return %c0_i32, %c0_i32_0 : i32, i32
  }
  func.func @transform_4(%arg0: i32) -> (i32, i32) {
    %c0_i32 = arith.constant 0 : i32
    %c0_i32_0 = arith.constant 0 : i32
    %c0_i32_1 = arith.constant 0 : i32
    return %c0_i32, %c0_i32_0 : i32, i32
  }
  func.func @transform_5(%arg0: i32) -> (i32, i32) {
    %c0_i32 = arith.constant 0 : i32
    %c0_i32_0 = arith.constant 0 : i32
    %c0_i32_1 = arith.constant 0 : i32
    return %c0_i32, %c0_i32_0 : i32, i32
  }
  func.func @transform_6(%arg0: i32) -> (i32, i32) {
    %c0_i32 = arith.constant 0 : i32
    %c0_i32_0 = arith.constant 0 : i32
    %c0_i32_1 = arith.constant 0 : i32
    return %c0_i32, %c0_i32_0 : i32, i32
  }
  func.func @transform_7(%arg0: i32) -> (i32, i32) {
    %c0_i32 = arith.constant 0 : i32
    %c0_i32_0 = arith.constant 0 : i32
    %c0_i32_1 = arith.constant 0 : i32
    return %c0_i32, %c0_i32_0 : i32, i32
  }
  func.func @transform_8(%arg0: i32) -> (i32, i32) {
    %c0_i32 = arith.constant 0 : i32
    %c0_i32_0 = arith.constant 0 : i32
    %c0_i32_1 = arith.constant 0 : i32
    return %c0_i32, %c0_i32_0 : i32, i32
  }
  func.func @transform_9(%arg0: i32) -> (i32, i32) {
    %c0_i32 = arith.constant 0 : i32
    %c0_i32_0 = arith.constant 0 : i32
    %c0_i32_1 = arith.constant 0 : i32
    return %c0_i32, %c0_i32_0 : i32, i32
  }
}

</mosaic_0001>

<bundles_post_ra>
// kernel: tpu_custom_call.1
= control target key start
LH: loop header
LB: loop body
LE: loop exit
PB: predicated region body
PF: predicated region fallthrough
CT: control target
= control target key end

     0   :  { %15 = vsyncpa [#allocation3], 0  ;;  %vm45_vm0 = vcmask 1041408   ;;  %vm41_vm1 = vcmask 31744   ;;  %s912_s0 = inlined_call_operand.vmem [shape: f32[8,256], index: 0, kind: input, shape index: {}]   ;;  %s913_s1 = inlined_call_operand.vmem [shape: f32[8,4], index: 1, kind: input, shape index: {}]   ;;  %s914_s2 = inlined_call_operand.vmem [shape: bf16[4,256], index: 2, kind: input, shape index: {}]   ;;  %s915_s3 = inlined_call_operand.vmem [shape: bf16[256,8], index: 3, kind: input, shape index: {}]   ;;  %s916_s4 = inlined_call_operand.vmem [shape: bf16[4,8], index: 4, kind: input, shape index: {}]   ;;  %s917_s5 = inlined_call_operand.vmem [shape: bf16[256,8], index: 5, kind: input, shape index: {}]   ;;  %s918_s6 = inlined_call_operand.vmem [shape: bf16[4,8], index: 6, kind: input, shape index: {}]   ;;  %s919_s7 = inlined_call_operand.hbm [shape: bf16[8,256], index: 7, kind: output, shape index: {0}]   ;;  %s920_s8 = inlined_call_operand.hbm [shape: bf16[8,8], index: 8, kind: output, shape index: {1}]   ;;  %s921_s9 = inlined_call_operand.hbm [shape: bf16[8,8], index: 9, kind: output, shape index: {2}]  }
   0x1   :  { %v36_v0 = vld [vmem:[%s914_s2] sm:$0xf]  ;;  %v638_v6 = vld [vmem:[%s917_s5 + $0x38] sm:$0xff]  ;;  %v637_v9 = vld [vmem:[%s917_s5 + $0x30] sm:$0xff] }
   0x2   :  { %v32_v1 = vld [vmem:[%s913_s1] sm:$0xff]  ;;  %38 = vst [vmem:[#allocation1] ss:$4 sm:$0xff] %v36_v0  ;;  %v646_v7 = vld [vmem:[%s917_s5 + $0x78] sm:$0xff]  ;;  %v645_v10 = vld [vmem:[%s917_s5 + $0x70] sm:$0xff] }
   0x3   :  { %v80_v2 = vld [vmem:[%s916_s4] sm:$0x3]  ;;  %v33_v8 = vpack.c.bf16 %v32_v1, %v32_v1  ;;  %v622_v11 = vld [vmem:[%s915_s3 + $0x38] sm:$0xff]  ;;  %v636_v13 = vld [vmem:[%s917_s5 + $0x28] sm:$0xff] }
   0x4   :  { %v97_v3 = vld [vmem:[%s918_s6] sm:$0x3]  ;;  %v82_v4 = vsel %vm45_vm0, %v80_v2, 0  ;;  %v630_v12 = vld [vmem:[%s915_s3 + $0x78] sm:$0xff]  ;;  %v644_v14 = vld [vmem:[%s917_s5 + $0x68] sm:$0xff] }
   0x5   :  { %v99_v5 = vsel %vm45_vm0, %v97_v3, 0  ;;  %91 = vmatpush.bf16.msra.mxu2 %v82_v4  ;;  %v621_v19 = vld [vmem:[%s915_s3 + $0x30] sm:$0xff] }
   0x6   :  { %108 = vmatpush.bf16.msra.mxu3 %v99_v5  ;;  %v629_v20 = vld [vmem:[%s915_s3 + $0x70] sm:$0xff] }
   0x8   :  { %485 = vmatmul.msk.bf16.vlgmr.msra.gmra.mxu2 %vm41_vm1, %v33_v8 }
   0x9   :  { %404 = vmatpush.bf16.msrb.mxu2 %v638_v6  ;;  %486 = vmatmul.msk.bf16.vlgmr.msra.gmra.mxu3 %vm41_vm1, %v33_v8  ;;  %v39_v15 = vld.sshfl [vmem:[#allocation1] sm:$0xff pattern:$0x73625140]  ;;  %v40_v16 = vld.sshfl [vmem:[#allocation1 + $0x8] sm:$0xff pattern:$0x73625140] }
   0xa   :  { %417 = vmatpush.bf16.msrb.mxu3 %v646_v7  ;;  %v46_v17 = vsel %vm45_vm0, %v39_v15, 0  ;;  %v48_v18 = vsel %vm45_vm0, %v40_v16, 0 }
   0xb   :  { %57 = vmatpush.bf16.msra.mxu0 %v46_v17  ;;  %70 = vmatpush.bf16.msra.mxu1 %v48_v18 }
   0xd   :  { %405 = vmatpush.bf16.msrb.mxu2 %v637_v9 }
   0xe   :  { %418 = vmatpush.bf16.msrb.mxu3 %v645_v10 }
   0xf   :  { %249 = vmatpush.bf16.msrb.mxu0 %v622_v11  ;;  %262 = vmatpush.bf16.msrb.mxu1 %v630_v12 }
  0x10   :  { %16 = vsyncpa [#allocation5], 0  ;;  %v635_v21 = vld [vmem:[%s917_s5 + $0x20] sm:$0xff]  ;;  %483 = vmatmul.msk.bf16.vlgmr.msra.gmra.mxu0 %vm41_vm1, %v33_v8  ;;  %484 = vmatmul.msk.bf16.vlgmr.msra.gmra.mxu1 %vm41_vm1, %v33_v8  ;;  %v620_v23 = vld [vmem:[%s915_s3 + $0x28] sm:$0xff]  ;;  %s726_s10 = smov [#allocation2]   ;;  %s727_s12 = smov [#allocation4]  }
  0x11   :  { %406 = vmatpush.bf16.msrb.mxu2 %v636_v13  ;;  %v643_v22 = vld [vmem:[%s917_s5 + $0x60] sm:$0xff]  ;;  %v628_v24 = vld [vmem:[%s915_s3 + $0x68] sm:$0xff]  ;;  %v634_v25 = vld [vmem:[%s917_s5 + $0x18] sm:$0xff]  ;;  %s441_s11 = sshll.u32 %s726_s10, 4  ;;  %s452_s13 = sshll.u32 %s727_s12, 4  ;;  %vm432_vm2 = vcmask 60416   ;;  %s442_s11 = int_to_ptr.vmem [resolvable:$true] %s441_s11  ;;  %s453_s13 = int_to_ptr.vmem [resolvable:$true] %s452_s13 }
  0x12   :  { %419 = vmatpush.bf16.msrb.mxu3 %v644_v14  ;;  %v642_v26 = vld [vmem:[%s917_s5 + $0x58] sm:$0xff]  ;;  %v619_v27 = vld [vmem:[%s915_s3 + $0x20] sm:$0xff]  ;;  %v633_v29 = vld [vmem:[%s917_s5 + $0x10] sm:$0xff]  ;;  %s454_s16 = sshll.u32 %s920_s8, 4  ;;  %s465_s19 = sshll.u32 %s921_s9, 4  ;;  %s455_s16 = int_to_ptr.hbm [resolvable:$true] %s454_s16  ;;  %s466_s19 = int_to_ptr.hbm [resolvable:$true] %s465_s19 }
  0x13   :  { %250 = vmatpush.bf16.msrb.mxu0 %v621_v19  ;;  %263 = vmatpush.bf16.msrb.mxu1 %v629_v20  ;;  %v627_v28 = vld [vmem:[%s915_s3 + $0x60] sm:$0xff]  ;;  %v641_v30 = vld [vmem:[%s917_s5 + $0x50] sm:$0xff]  ;;  %v618_v31 = vld [vmem:[%s915_s3 + $0x18] sm:$0xff] }
  0x14   :  { %v626_v32 = vld [vmem:[%s915_s3 + $0x58] sm:$0xff]  ;;  %v617_v33 = vld [vmem:[%s915_s3 + $0x10] sm:$0xff]  ;;  %v616_v35 = vld [vmem:[%s915_s3 + $0x8] sm:$0xff] }
  0x15   :  { %407 = vmatpush.bf16.msrb.mxu2 %v635_v21  ;;  %v625_v34 = vld [vmem:[%s915_s3 + $0x50] sm:$0xff]  ;;  %v624_v36 = vld [vmem:[%s915_s3 + $0x48] sm:$0xff]  ;;  %v615_v39 = vld [vmem:[%s915_s3] sm:$0xff] }
  0x16   :  { %420 = vmatpush.bf16.msrb.mxu3 %v643_v22  ;;  %v632_v37 = vld [vmem:[%s917_s5 + $0x8] sm:$0xff]  ;;  %v623_v40 = vld [vmem:[%s915_s3 + $0x40] sm:$0xff] }
  0x17   :  { %251 = vmatpush.bf16.msrb.mxu0 %v620_v23  ;;  %264 = vmatpush.bf16.msrb.mxu1 %v628_v24  ;;  %v640_v38 = vld [vmem:[%s917_s5 + $0x48] sm:$0xff]  ;;  %v631_v41 = vld [vmem:[%s917_s5] sm:$0xff] }
  0x18   :  { %v639_v42 = vld [vmem:[%s917_s5 + $0x40] sm:$0xff]  ;;  %v35_v44 = vld [vmem:[%s912_s0 + $0x8] sm:$0xff]  ;;  %s443_s5 = sshll.u32 %s919_s7, 4  ;;  %s728_s7 = smov [#allocation6]   ;;  %s444_s5 = int_to_ptr.hbm [resolvable:$true] %s443_s5 }
  0x19   :  { %408 = vmatpush.bf16.msrb.mxu2 %v634_v25  ;;  %v34_v43 = vld [vmem:[%s912_s0] sm:$0xff]  ;;  %s463_s17 = sshll.u32 %s728_s7, 4  ;;  %s464_s17 = int_to_ptr.vmem [resolvable:$true] %s463_s17 }
  0x1a   :  { %421 = vmatpush.bf16.msrb.mxu3 %v642_v26 }
  0x1b   :  { %252 = vmatpush.bf16.msrb.mxu0 %v619_v27  ;;  %265 = vmatpush.bf16.msrb.mxu1 %v627_v28 }
  0x1d   :  { %409 = vmatpush.bf16.msrb.mxu2 %v633_v29 }
  0x1e   :  { %422 = vmatpush.bf16.msrb.mxu3 %v641_v30 }
  0x1f   :  { %253 = vmatpush.bf16.msrb.mxu0 %v618_v31  ;;  %266 = vmatpush.bf16.msrb.mxu1 %v626_v32 }
  0x21   :  { %410 = vmatpush.bf16.msrb.mxu2 %v632_v37 }
  0x22   :  { %423 = vmatpush.bf16.msrb.mxu3 %v640_v38 }
  0x23   :  { %254 = vmatpush.bf16.msrb.mxu0 %v617_v33  ;;  %267 = vmatpush.bf16.msrb.mxu1 %v625_v34 }
  0x25   :  { %411 = vmatpush.bf16.msrb.mxu2 %v631_v41 }
  0x26   :  { %424 = vmatpush.bf16.msrb.mxu3 %v639_v42 }
  0x27   :  { %255 = vmatpush.bf16.msrb.mxu0 %v616_v35  ;;  %268 = vmatpush.bf16.msrb.mxu1 %v624_v36 }
  0x2b   :  { %256 = vmatpush.bf16.msrb.mxu0 %v615_v39  ;;  %269 = vmatpush.bf16.msrb.mxu1 %v623_v40 }
  0x8b   :  { %v93_v45 = vpop.f32.mrf.mxu2 }
  0x8c   :  { %v110_v46 = vpop.f32.mrf.mxu3 }
  0x8d   :  { %v59_v47 = vpop.f32.mrf.mxu0  ;;  %v72_v48 = vpop.f32.mrf.mxu1 }
  0x8e   :  { %v76_v49 = vadd.f32 %v59_v47, %v34_v43  ;;  %v77_v50 = vadd.f32 %v72_v48, %v35_v44 }
  0x90   :  { %v78_v51 = vpack.c.bf16 %v77_v50, %v76_v49 }
  0x92   :  { %79 = vst [vmem:[#allocation2] sm:$0xff] %v78_v51  ;;  %v147_v52 = vunpack.c.l.b16 %v78_v51  ;;  %v148_v53 = vunpack.c.h.b16 %v78_v51 }
  0x93   :  { %v95_v56 = vpop.f32.mrf.mxu2  ;;  %446 = dma.vmem_to_hbm [thread:$0]  %s442_s11, 128, %s444_s5, [#allocation3]  }
  0x94   :  { %v149_v54 = vpack.c.b16 %v147_v52, %v147_v52  ;;  %v150_v55 = vpack.c.b16 %v148_v53, %v148_v53  ;;  %v112_v57 = vpop.f32.mrf.mxu3 }
  0x95   :  { %v61_v58 = vpop.f32.mrf.mxu0  ;;  %v74_v59 = vpop.f32.mrf.mxu1 }
  0x96   :  { %257 = vmatmul.bf16.vlgmr.msrb.gmra.mxu0 %v149_v54  ;;  %270 = vmatmul.bf16.vlgmr.msrb.gmra.mxu1 %v150_v55 }
  0x97   :  { %412 = vmatmul.bf16.vlgmr.msrb.gmra.mxu2 %v149_v54  ;;  %425 = vmatmul.bf16.vlgmr.msrb.gmra.mxu3 %v150_v55 }
 0x113   :  { %v258_v60 = vpop.f32.mrf.mxu0  ;;  %v271_v61 = vpop.f32.mrf.mxu1 }
 0x114   :  { %v272_v62 = vadd.f32 %v271_v61, %v258_v60 }
 0x116   :  { %v275_v63 = vmul.f32 %v272_v62, %v93_v45 }
 0x118   :  { %v431_v0 = vpack.c.bf16 %v275_v63, %v275_v63 }
 0x11a   :  { %v413_v1 = vpop.f32.mrf.mxu2  ;;  %v426_v2 = vpop.f32.mrf.mxu3  ;;  %433 = vst.msk [vmem:[#allocation4] sm:$0xf] %vm432_vm2, %v431_v0 }
 0x11b   :  { %v427_v3 = vadd.f32 %v426_v2, %v413_v1  ;;  %v260_v4 = vpop.f32.mrf.mxu0  ;;  %v273_v5 = vpop.f32.mrf.mxu1  ;;  %457 = dma.vmem_to_hbm [thread:$0]  %s453_s13, 64, %s455_s16, [#allocation5]  }
 0x11d   :  { %v430_v6 = vmul.f32 %v427_v3, %v110_v46 }
 0x11f   :  { %v434_v7 = vpack.c.bf16 %v430_v6, %v430_v6 }
 0x121   :  { %435 = vst.msk [vmem:[#allocation6] sm:$0xf] %vm432_vm2, %v434_v7 }
 0x122   :  { %v415_v8 = vpop.f32.mrf.mxu2  ;;  %v428_v9 = vpop.f32.mrf.mxu3  ;;  %468 = dma.vmem_to_hbm [thread:$0]  %s464_s17, 64, %s466_s19, [#allocation5]  }
 0x123   :  { %722 = dma.done.wait [#allocation3], 128  }
 0x124   :  { %723 = vsyncadd [#allocation3], 4294967168 }
 0x125   :  { %724 = dma.done.wait [#allocation5], 128  }
 0x126   :  { %725 = vsyncadd [#allocation5], 4294967168 }
 0x127   :  { %481 = vsyncpa [#allocation3], 1 }
 0x128   :  { %482 = vsyncpa [#allocation5], 1 }

</bundles_post_ra>
